<compile_context>
chip_gen: v7x
topology: tpu7x:2x2x1
jax: 0.10.0
libtpu: 0.0.40
codegen_flags: <defaults>
</compile_context>

<pallas_src>
import jax
import jax.numpy as jnp
from jax.experimental import pallas as pl
from jax.experimental.pallas import tpu as pltpu

EPS = 1e-5


def _context_gating_kernel(x_ref, w_ref, gamma_ref, beta_ref, o_ref, acc_ref):
    n = pl.program_id(0)
    k = pl.program_id(1)
    tk = w_ref.shape[0]
    tn = w_ref.shape[1]

    @pl.when(k == 0)
    def _():
        acc_ref[...] = jnp.zeros_like(acc_ref)

    # Small (B, tk) x slice cast to bf16 -> native bf16 x bf16 -> f32 MXU matmul
    # against the streamed (tk, tn) bf16 weight tile.  No f32 widening of the weight.
    off_k = pl.multiple_of(k * tk, tk)
    xk = x_ref[:, pl.ds(off_k, tk)].astype(jnp.bfloat16)
    acc_ref[...] += jnp.dot(xk, w_ref[...], preferred_element_type=jnp.float32)

    @pl.when(k == pl.num_programs(1) - 1)
    def _():
        x1 = acc_ref[...]                                      # (B, tn) f32
        inv_b = 1.0 / x1.shape[0]
        # Two-pass (centered) batch statistics on the resident accumulator:
        # numerically safe (sum of squares of centered values is >= 0 by construction).
        mean = jnp.sum(x1, axis=0, keepdims=True) * inv_b       # (1, tn)
        centered = x1 - mean
        var = jnp.sum(centered * centered, axis=0, keepdims=True) * inv_b
        scale = gamma_ref[...] * jax.lax.rsqrt(var + EPS)
        gate = jax.nn.sigmoid(centered * scale + beta_ref[...])  # logistic -> EUP
        off_n = pl.multiple_of(n * tn, tn)
        xg = x_ref[:, pl.ds(off_n, tn)]                          # f32 gate operand
        o_ref[...] = (xg * gate).astype(o_ref.dtype)


def _pick_tile(d, target):
    """Largest multiple of 128 that divides d and is <= target (d must be a multiple of 128)."""
    t = min(d, max(128, target - target % 128))
    t -= t % 128
    while d % t:
        t -= 128
    return t


def context_gating(x, w, b, gamma, beta, *, tn=1024, tk=2048):
    """ContextGating forward.

    x:     (B, D) activations (f32).
    w:     (D, D) PyTorch nn.Linear weight in (out_features, in_features) layout;
           f32 or bf16 -- it is streamed as bf16 either way.
    b:     (D,) fc bias.  Mathematically cancelled by training-mode BatchNorm, so unused.
    gamma: (D,) BatchNorm weight.   beta: (D,) BatchNorm bias.
    tn/tk: output-feature / contraction tile sizes (multiples of 128).  Defaults give
           a 4 MiB bf16 weight tile per grid step (amortizes per-step overhead on
           v6e/v7x) while staying well inside v7x's 64 MiB VMEM double-buffered.
    """
    del b  # fc bias is a no-op under training-mode BatchNorm (batch mean is subtracted).
    B, D = x.shape
    assert w.shape == (D, D)

    # Pad the feature dim to a multiple of 128 so tiles are always legal and the
    # weight is always streamed (never a full (D, D) VMEM block).  Padding is inert:
    # padded W rows/cols and gamma/beta are zero, padded x columns are zero, and the
    # padded output columns are sliced off.
    D_pad = ((D + 127) // 128) * 128
    if D_pad != D:
        p = D_pad - D
        x_p = jnp.pad(x, ((0, 0), (0, p)))
        w_p = jnp.pad(w, ((0, p), (0, p)))
        gamma_p = jnp.pad(gamma, (0, p))
        beta_p = jnp.pad(beta, (0, p))
    else:
        x_p, w_p, gamma_p, beta_p = x, w, gamma, beta

    # Pre-transpose once to (in, out) so the kernel contracts (B,tk)@(tk,tn) with no
    # hidden per-tile relayout.  Stream as bf16 (halves HBM weight traffic).
    wt = w_p.T.astype(jnp.bfloat16)

    tn = _pick_tile(D_pad, tn)
    tk = _pick_tile(D_pad, tk)
    # v7x megacore load balance: prefer an even number of output tiles on the
    # "parallel" n axis.
    if (D_pad // tn) > 1 and (D_pad // tn) % 2 == 1 and tn % 256 == 0:
        tn //= 2
    grid = (D_pad // tn, D_pad // tk)          # reduction (k) axis last

    gamma2 = gamma_p.reshape(1, D_pad).astype(jnp.float32)
    beta2 = beta_p.reshape(1, D_pad).astype(jnp.float32)

    # VMEM budget: resident x + double-buffered bf16 W stream + double-buffered out
    # + f32 accumulator + (tiny) BN params, plus slack.
    vmem_needed = (
        B * D_pad * 4                      # x, resident full block
        + 2 * tn * tk * 2                  # W tiles, double-buffered bf16
        + 2 * B * tn * 4                   # output tiles, double-buffered
        + B * tn * 4                       # f32 accumulator scratch
        + 2 * 2 * D_pad * 4                # gamma/beta tiles (upper bound)
        + (2 << 20))                       # slack
    # TODO(synk): very large activations (B*D*4 beyond this budget) need a
    # streamed-x variant instead of keeping the full activation resident.
    assert vmem_needed <= (56 << 20), (
        f"VMEM budget exceeded ({vmem_needed} bytes); shrink tn/tk or stream x.")
    vmem_limit = int(max(vmem_needed, 32 << 20))

    out = pl.pallas_call(
        _context_gating_kernel,
        out_shape=jax.ShapeDtypeStruct((B, D_pad), x.dtype),
        grid_spec=pltpu.PrefetchScalarGridSpec(
            num_scalar_prefetch=0,
            grid=grid,
            in_specs=[
                pl.BlockSpec((B, D_pad), lambda n, k: (0, 0)),  # x, resident (whole batch)
                pl.BlockSpec((tk, tn), lambda n, k: (k, n)),    # W^T (in,out), streamed bf16
                pl.BlockSpec((1, tn), lambda n, k: (0, n)),     # BN gamma
                pl.BlockSpec((1, tn), lambda n, k: (0, n)),     # BN beta
            ],
            out_specs=pl.BlockSpec((B, tn), lambda n, k: (0, n)),
            scratch_shapes=[pltpu.VMEM((B, tn), jnp.float32)],
        ),
        compiler_params=pltpu.CompilerParams(
            dimension_semantics=("parallel", "arbitrary"),
            vmem_limit_bytes=vmem_limit),
    )(x_p, wt, gamma2, beta2)

    return out[:, :D] if D_pad != D else out


def _reference(x, w, b, gamma, beta):
    """Pure-JAX reference matching the PyTorch module in training mode (f32 math)."""
    w32 = w.astype(jnp.float32)
    x1 = x @ w32.T + b
    mean = jnp.mean(x1, axis=0, keepdims=True)
    var = jnp.mean((x1 - mean) ** 2, axis=0, keepdims=True)
    x1 = (x1 - mean) / jnp.sqrt(var + EPS) * gamma + beta
    return x * jax.nn.sigmoid(x1)


if __name__ == "__main__":
    key = jax.random.PRNGKey(0)

    def run_case(B, D, tn, tk):
        kx, kw, kb, kg, kbe = jax.random.split(jax.random.fold_in(key, D), 5)
        x = jax.random.normal(kx, (B, D), dtype=jnp.float32)
        bound = 1.0 / jnp.sqrt(jnp.float32(D))
        # Weight in PyTorch (out, in) layout, stored as bf16.
        w = jax.random.uniform(kw, (D, D), jnp.float32, -bound, bound).astype(jnp.bfloat16)
        b = jax.random.uniform(kb, (D,), jnp.float32, -bound, bound)
        gamma = 1.0 + 0.1 * jax.random.normal(kg, (D,), jnp.float32)  # BN weight
        beta = 0.1 * jax.random.normal(kbe, (D,), jnp.float32)        # BN bias

        out = jax.block_until_ready(context_gating(x, w, b, gamma, beta, tn=tn, tk=tk))
        ref = _reference(x, w, b, gamma, beta)
        assert out.shape == (B, D)
        # bf16 MXU inputs (weights + in-kernel x cast) vs. the all-f32 reference.
        err = float(jnp.max(jnp.abs(out - ref)))
        assert err < 1e-2, f"mismatch vs reference (B={B}, D={D}): {err}"

    # Small tiles forced so the demo exercises a real 2x2 (n, k) grid + accumulator path.
    run_case(B=8, D=256, tn=128, tk=128)
    # Feature dim not a multiple of 128 exercises the padding guard.
    run_case(B=8, D=200, tn=128, tk=128)
    print("KERNEL_OK")
</pallas_src>

<mosaic_0001>
module attributes {stable_mosaic.version = 11 : i64} {
  func.func @_context_gating_kernel(%arg0: i32, %arg1: i32, %arg2: memref<8x256xf32, #tpu.memory_space<vmem>>, %arg3: memref<128x128xbf16, #tpu.memory_space<vmem>>, %arg4: memref<1x128xf32, #tpu.memory_space<vmem>>, %arg5: memref<1x128xf32, #tpu.memory_space<vmem>>, %arg6: memref<8x128xf32, #tpu.memory_space<vmem>>, %arg7: memref<8x128xf32, #tpu.memory_space<vmem>>) attributes {dimension_semantics = [#tpu.dimension_semantics<parallel>, #tpu.dimension_semantics<arbitrary>], iteration_bounds = array<i64: 2, 2>, scalar_prefetch = 0 : i64, scratch_operands = 1 : i64, tpu.core_type = #tpu.core_type<tc>, window_params = [{pipeline_mode = #tpu.pipeline_mode<synchronous>, transform_indices = @transform_0, window_bounds = array<i64: 8, 256>}, {transform_indices = @transform_1, window_bounds = array<i64: 128, 128>}, {transform_indices = @transform_2, window_bounds = array<i64: 1, 128>}, {transform_indices = @transform_3, window_bounds = array<i64: 1, 128>}, {transform_indices = @transform_4, window_bounds = array<i64: 8, 128>}]} {
    %c0_i32 = arith.constant 0 : i32
    %0 = arith.cmpi eq, %arg1, %c0_i32 : i32
    %1 = arith.extui %0 : i1 to i32
    %c0_i32_0 = arith.constant 0 : i32
    %2 = arith.cmpi ne, %1, %c0_i32_0 : i32
    scf.if %2 {
      %cst_8 = arith.constant 0.000000e+00 : f32
      %16 = vector.broadcast %cst_8 : f32 to vector<8x128xf32>
      %c0_9 = arith.constant 0 : index
      %c0_10 = arith.constant 0 : index
      %17 = vector.load %arg7[%c0_9, %c0_10] : memref<8x128xf32, #tpu.memory_space<vmem>>, vector<8x128xf32>
      tpu.vector_store %arg7[%c0_9, %c0_10], %16 {strides = array<i32>} : memref<8x128xf32, #tpu.memory_space<vmem>>, vector<8x128xf32>,
    } else {
    }
    %c128_i32 = arith.constant 128 : i32
    %3 = arith.muli %arg1, %c128_i32 : i32
    %4 = tpu.assume_multiple %3, 128 : i32
    %c0 = arith.constant 0 : index
    %5 = arith.index_cast %4 : i32 to index
    %6 = vector.load %arg2[%c0, %5] : memref<8x256xf32, #tpu.memory_space<vmem>>, vector<8x128xf32>
    %7 = arith.truncf %6 : vector<8x128xf32> to vector<8x128xbf16>
    %c0_1 = arith.constant 0 : index
    %c0_2 = arith.constant 0 : index
    %8 = vector.load %arg7[%c0_1, %c0_2] : memref<8x128xf32, #tpu.memory_space<vmem>>, vector<8x128xf32>
    %c0_3 = arith.constant 0 : index
    %c0_4 = arith.constant 0 : index
    %9 = vector.load %arg3[%c0_3, %c0_4] : memref<128x128xbf16, #tpu.memory_space<vmem>>, vector<128x128xbf16>
    %cst = arith.constant dense<0.000000e+00> : vector<8x128xf32>
    %10 = tpu.matmul %7, %9, %cst {dimension_numbers = #tpu.dot_dimension_numbers<[1], [0], [0], [1], [0, 0, 1, 1], [], []>} : vector<8x128xbf16>, vector<128x128xbf16>, vector<8x128xf32> -> vector<8x128xf32>
    %11 = arith.addf %8, %10 : vector<8x128xf32>
    %c0_5 = arith.constant 0 : index
    %c0_6 = arith.constant 0 : index
    %12 = vector.load %arg7[%c0_5, %c0_6] : memref<8x128xf32, #tpu.memory_space<vmem>>, vector<8x128xf32>
    tpu.vector_store %arg7[%c0_5, %c0_6], %11 {strides = array<i32>} : memref<8x128xf32, #tpu.memory_space<vmem>>, vector<8x128xf32>,
    %c1_i32 = arith.constant 1 : i32
    %13 = arith.cmpi eq, %arg1, %c1_i32 : i32
    %14 = arith.extui %13 : i1 to i32
    %c0_i32_7 = arith.constant 0 : i32
    %15 = arith.cmpi ne, %14, %c0_i32_7 : i32
    scf.if %15 {
      %c0_8 = arith.constant 0 : index
      %c0_9 = arith.constant 0 : index
      %16 = vector.load %arg7[%c0_8, %c0_9] : memref<8x128xf32, #tpu.memory_space<vmem>>, vector<8x128xf32>
      %cst_10 = arith.constant dense<0.000000e+00> : vector<128xf32>
      %17 = vector.multi_reduction <add>, %16, %cst_10 [0] : vector<8x128xf32> to vector<128xf32>
      %18 = vector.shape_cast %17 : vector<128xf32> to vector<1x128xf32>
      %cst_11 = arith.constant 1.250000e-01 : f32
      %19 = vector.broadcast %cst_11 : f32 to vector<1x128xf32>
      %20 = arith.mulf %18, %19 : vector<1x128xf32>
      %21 = vector.broadcast %20 : vector<1x128xf32> to vector<8x128xf32>
      %22 = arith.subf %16, %21 : vector<8x128xf32>
      %23 = arith.mulf %22, %22 : vector<8x128xf32>
      %cst_12 = arith.constant dense<0.000000e+00> : vector<128xf32>
      %24 = vector.multi_reduction <add>, %23, %cst_12 [0] : vector<8x128xf32> to vector<128xf32>
      %25 = vector.shape_cast %24 : vector<128xf32> to vector<1x128xf32>
      %cst_13 = arith.constant 1.250000e-01 : f32
      %26 = vector.broadcast %cst_13 : f32 to vector<1x128xf32>
      %27 = arith.mulf %25, %26 : vector<1x128xf32>
      %c0_14 = arith.constant 0 : index
      %c0_15 = arith.constant 0 : index
      %28 = vector.load %arg4[%c0_14, %c0_15] : memref<1x128xf32, #tpu.memory_space<vmem>>, vector<1x128xf32>
      %cst_16 = arith.constant 9.99999974E-6 : f32
      %29 = vector.broadcast %cst_16 : f32 to vector<1x128xf32>
      %30 = arith.addf %27, %29 : vector<1x128xf32>
      %31 = math.rsqrt %30 : vector<1x128xf32>
      %32 = arith.mulf %28, %31 : vector<1x128xf32>
      %33 = vector.broadcast %32 : vector<1x128xf32> to vector<8x128xf32>
      %34 = arith.mulf %22, %33 : vector<8x128xf32>
      %c0_17 = arith.constant 0 : index
      %c0_18 = arith.constant 0 : index
      %35 = vector.load %arg5[%c0_17, %c0_18] : memref<1x128xf32, #tpu.memory_space<vmem>>, vector<1x128xf32>
      %36 = vector.broadcast %35 : vector<1x128xf32> to vector<8x128xf32>
      %37 = arith.addf %34, %36 : vector<8x128xf32>
      %38 = arith.negf %37 : vector<8x128xf32>
      %39 = math.exp %38 : vector<8x128xf32>
      %cst_19 = arith.constant 1.000000e+00 : f32
      %40 = vector.broadcast %cst_19 : f32 to vector<8x128xf32>
      %41 = arith.addf %40, %39 : vector<8x128xf32>
      %42 = arith.divf %40, %41 : vector<8x128xf32>
      %c128_i32_20 = arith.constant 128 : i32
      %43 = arith.muli %arg0, %c128_i32_20 : i32
      %44 = tpu.assume_multiple %43, 128 : i32
      %c0_21 = arith.constant 0 : index
      %45 = arith.index_cast %44 : i32 to index
      %46 = vector.load %arg2[%c0_21, %45] : memref<8x256xf32, #tpu.memory_space<vmem>>, vector<8x128xf32>
      %47 = arith.mulf %46, %42 : vector<8x128xf32>
      %c0_22 = arith.constant 0 : index
      %c0_23 = arith.constant 0 : index
      %48 = vector.load %arg6[%c0_22, %c0_23] : memref<8x128xf32, #tpu.memory_space<vmem>>, vector<8x128xf32>
      tpu.vector_store %arg6[%c0_22, %c0_23], %47 {strides = array<i32>} : memref<8x128xf32, #tpu.memory_space<vmem>>, vector<8x128xf32>,
    } else {
    }
    return
  }
  func.func @transform_0(%arg0: i32, %arg1: i32) -> (i32, i32) {
    %c0_i32 = arith.constant 0 : i32
    %c0_i32_0 = arith.constant 0 : i32
    %c0_i32_1 = arith.constant 0 : i32
    return %c0_i32, %c0_i32_0 : i32, i32
  }
  func.func @transform_1(%arg0: i32, %arg1: i32) -> (i32, i32) {
    %c0_i32 = arith.constant 0 : i32
    return %arg1, %arg0 : i32, i32
  }
  func.func @transform_2(%arg0: i32, %arg1: i32) -> (i32, i32) {
    %c0_i32 = arith.constant 0 : i32
    %c0_i32_0 = arith.constant 0 : i32
    return %c0_i32, %arg0 : i32, i32
  }
  func.func @transform_3(%arg0: i32, %arg1: i32) -> (i32, i32) {
    %c0_i32 = arith.constant 0 : i32
    %c0_i32_0 = arith.constant 0 : i32
    return %c0_i32, %arg0 : i32, i32
  }
  func.func @transform_4(%arg0: i32, %arg1: i32) -> (i32, i32) {
    %c0_i32 = arith.constant 0 : i32
    %c0_i32_0 = arith.constant 0 : i32
    return %c0_i32, %arg0 : i32, i32
  }
}

</mosaic_0001>

<bundles_post_ra>
// kernel: tpu_custom_call.1
= control target key start
LH: loop header
LB: loop body
LE: loop exit
PB: predicated region body
PF: predicated region fallthrough
CT: control target
= control target key end

     0   :  { %s1297_s0 = inlined_call_operand.hbm [shape: f32[8,256], index: 0, kind: input, shape index: {}]   ;;  %s1298_s1 = inlined_call_operand.hbm [shape: bf16[256,256], index: 1, kind: input, shape index: {}]   ;;  %s1299_s2 = inlined_call_operand.vmem [shape: f32[1,256], index: 2, kind: input, shape index: {}]   ;;  %s1300_s3 = inlined_call_operand.vmem [shape: f32[1,256], index: 3, kind: input, shape index: {}]   ;;  %s1301_s4 = inlined_call_operand.hbm [shape: f32[8,256], index: 4, kind: output, shape index: {}]  }
   0x1   :  { %1315 = sst [smem:[#allocation18_spill]] %s1297_s0 }
   0x2   :  { %9 = vsyncpa [#allocation4], 0 }
   0x3   :  { %10 = vsyncpa [#allocation7], 0 }
   0x4   :  { %12 = vsyncpa [#allocation7 + $0x1], 0 }
   0x5   :  { %13 = vsyncpa [#allocation5], 0 }
   0x6   :  { %15 = vsyncpa [#allocation5 + $0x1], 0  ;;  %s995_s15 = smov 0   ;;  %s997_s16 = smov 0  }
   0x7   :  { %s999_s17 = smov 0   ;;  %s1001_s18 = smov 0  }
   0x8   :  { %s1003_s19 = smov 0   ;;  %s1005_s20 = smov 0  }
   0x9   :  { %s1007_s21 = smov 0   ;;  %s1009_s22 = smov 0  }
   0xa   :  { %s1011_s23 = smov 0   ;;  %s1013_s24 = smov 0  }
   0xb   :  { %s1015_s25 = smov 0  }
   0xc LB: > { %1316 = sst [smem:[#allocation12_spill]] %s919_s15  ;;  %s579_s26 = sadd.s32 4294967295, %s959_s25   ;;  %s959_s25 = sphi %s1015_s25, %s21_s25   ;;  %s955_s24 = sphi %s1013_s24, %s1352_s24   ;;  %s951_s23 = sphi %s1011_s23, %s1343_s23   ;;  %s947_s22 = sphi %s1009_s22, %s1351_s22   ;;  %s943_s21 = sphi %s1007_s21, %s1342_s21   ;;  %s939_s20 = sphi %s1005_s20, %s1350_s20   ;;  %s935_s19 = sphi %s1003_s19, %s1349_s19   ;;  %s931_s18 = sphi %s1001_s18, %s1348_s18   ;;  %s927_s17 = sphi %s999_s17, %s1347_s17   ;;  %s923_s16 = sphi %s997_s16, %s1346_s16   ;;  %s919_s15 = sphi %s995_s15, %s1345_s15  }
   0xd   : > { %1317 = sst [smem:[#allocation13_spill]] %s951_s23  ;;  %s580_s27 = sadd.s32 4294967294, %s959_s25  }
   0xe   : > { %1318 = sst [smem:[#allocation14_spill]] %s959_s25  ;;  %p70_p0 = scmp.ne.s32.totalorder %s939_s20, %s935_s19 }
   0xf   : > { %p71_p1 = scmp.eq.s32.totalorder %s959_s25, 0  ;;  %p76_p2 = scmp.ne.s32.totalorder %s935_s19, %s931_s18 }
  0x10   : > { %p1055_p3 = scmp.eq.s32.totalorder %s579_s26, 0  ;;  %p151_p5 = scmp.ne.s32.totalorder %s927_s17, %s923_s16 }
  0x11   : > { %p1060_p4 = por %p71_p1, %p70_p0  ;;  %p152_p7 = scmp.eq.s32.totalorder %s579_s26, 3 }
  0x12   : > { %s1319_s29 = scalar_select %p1055_p3, 1, 0 }
  0x13   : > { %p1068_p6 = por %p1055_p3, %p76_p2  ;;  %p157_p8 = scmp.ne.s32.totalorder %s923_s16, %s919_s15 }
  0x14   : > { %p158_p9 = scmp.eq.s32.totalorder %s580_s27, 3  ;;  %p1074_p10 = por %p152_p7, %p151_p5 }
  0x15   : > { %s1321_s6 = scalar_select %p1068_p6, 1, 0 }
  0x16   : > { %s1322_s7 = scalar_select %p1074_p10, 1, 0 }
  0x17   : > { %p581_p11 = scmp.ge.s32.totalorder %s959_s25, 1  ;;  %p1079_p12 = por %p158_p9, %p157_p8 }
  0x18   : > { %p165_p13 = scmp.lt.s32.totalorder %s959_s25, 5  ;;  %s961_s10 = smov [#allocation3]  }
  0x19   : > { %s1323_s8 = scalar_select %p1079_p12, 1, 0 }
  0x1a   : > { %p1084_p0 = pnand %p581_p11, %p165_p13  ;;  %s178_s11 = sshll.u32 %s961_s10, 4  ;;  %s179_s11 = int_to_ptr.vmem [resolvable:$true] %s178_s11 }
  0x1b   : > { %1324 = sst [smem:[#allocation15_spill]] %s1323_s8  ;;  %p663_p2 = scmp.lt.s32.totalorder %s959_s25, 4 }
  0x1c   : > { %s1325_s9 = scalar_select %p1084_p0, 1, 0 }
  0x1d   : > { %p650_p1 = pneg %p1084_p0  ;;  %p1099_p7 = pnand %p663_p2, %p1060_p4 }
  0x1e   : > { %s1328_s0 = sld [smem:[#allocation18_spill]] }
  0x1f   : > { %p1093_p5 = pnand %p650_p1, %p1055_p3 }
  0x20   : > { %s1327_s13 = scalar_select %p1099_p7, 1, 0 }
  0x21   : > { %p777_p9 = pneg %p1093_p5 }
  0x24   : > { %s775_s26 = scalar_lea.hbm %s1328_s0, 256 }
  0x25   : > { %p776_p8 = scmp.ne.s32.totalorder %s1328_s0, %s775_s26  ;;  %p782_p1 = scmp.lt.u32.totalorder %s775_s26, %s1328_s0 }
  0x27   : > { %p778_p11 = pnand %p777_p9, %p776_p8 }
  0x29   : > { %p779_p13 = pneg %p778_p11 }
  0x2b   : > { %p784_p4 = pnand %p782_p1, %p779_p13 }
  0x2d   : > { %787 = shalt.err (!%p784_p4)
}
  0x2e   : > { %s788_s5 = scalar_lea.vmem %s179_s11, 256  ;;  %p796_p6 = scmp.lt.s32.totalorder %s179_s11, %s179_s11 }
  0x2f   : > { %p789_p2 = scmp.ne.s32.totalorder %s179_s11, %s788_s5  ;;  %p797_p3 = scmp.lt.s32.totalorder %s788_s5, %s788_s5 }
  0x31   : > { %p791_p12 = pnand %p789_p2, %p777_p9  ;;  %p798_p0 = por %p797_p3, %p796_p6 }
  0x33   : > { %p792_p10 = pneg %p791_p12 }
  0x35   : > { %p799_p7 = pnand %p798_p0, %p792_p10 }
  0x37   : > { %802 = shalt.err (!%p799_p7)
}
  0x38   : > { %653 = dma.hbm_to_vmem [thread:$0]  (!%p1093_p5), %s1328_s0, 256, %s179_s11, [#allocation4]  }
  0x39   : > { %s30_s28 = sadd.s32 1, %s951_s23  ;;  %s33_s30 = sadd.s32 1, %s955_s24 }
  0x3a   : > { %p31_p12 = scmp.ge.s32.totalorder %s30_s28, 2  ;;  %s189_s26 = sand.u32 1, %s939_s20  }
  0x3b   : > { %s584_s27 = sshll.u32 %s189_s26, 6  ;;  %s612_s10 = sshll.u32 %s951_s23, 5 }
  0x3c   : > { %s1354_s28 = smov (%p31_p12, %s30_s28), 0  ;;  %s1356_s30 = smov (!%p31_p12, %s33_s30), %s955_s24 }
  0x3d   : > { %1329 = sst [smem:[#allocation16_spill]] %s1354_s28  ;;  %s58_s12 = ssub.s32 %s951_s23, %s1354_s28 }
  0x3e   : > { %p35_p3 = scmp.ge.s32.totalorder %s1356_s30, 2  ;;  %s199_s5 = sadd.s32 %s955_s24, %s612_s10 }
  0x3f   : > { %s193_s11 = scalar_lea.vmem [#allocation6], %s584_s27  ;;  %s587_s18 = sshll.u32 %s199_s5, 6 }
  0x40   : > { %s202_s14 = sshll.u32 %s193_s11, 4  ;;  %s1358_s30 = smov (%p35_p3, %s1356_s30), 0  ;;  %s1131_s14 = int_to_ptr.vmem [resolvable:$true] %s202_s14 }
  0x41   : > { %1330 = sst [smem:[#allocation17_spill]] %s1358_s30  ;;  %s59_s0 = ssub.s32 %s955_s24, %s1358_s30 }
  0x42   : > { %s1138_s25 = scalar_lea.hbm %s1298_s1, %s587_s18  ;;  %s60_s10 = sor.u32 %s59_s0, %s58_s12 }
  0x43   : > { %p139_p6 = scmp.eq.s32.totalorder %s59_s0, 0  ;;  %p61_p10 = scmp.eq.s32.totalorder %s60_s10, 0 }
  0x44   : > { %s1331_s27 = sadd.s32 1, %s927_s17  ;;  %s1332_s28 = sadd.s32 1, %s939_s20 }
  0x45   : > { %s1143_s11 = scalar_select %p139_p6, %s927_s17, %s1331_s27  }
  0x46   : > { %s1148_s5 = scalar_select %p61_p10, %s939_s20, %s1332_s28  }
  0x47   : > { %s1150_s23 = scalar_lea.sflag [#allocation7], %s189_s26  ;;  %s803_s30 = scalar_lea.hbm %s1138_s25, 1024 }
  0x48   : > { %p804_p0 = scmp.ne.s32.totalorder %s1138_s25, %s803_s30  ;;  %p1333_p5 = scmp.ne.s32.totalorder %s1327_s13, 0 }
  0x49   : > { %s808_s0 = scalar_lea.hbm %s1298_s1, 4096  ;;  %p809_p11 = scmp.lt.u32.totalorder %s1138_s25, %s1298_s1 }
  0x4a   : > { %p805_p7 = pneg %p1333_p5  ;;  %p810_p13 = scmp.lt.u32.totalorder %s808_s0, %s803_s30 }
  0x4b   : > { %p812_p4 = scmp.lt.u32.totalorder %s803_s30, %s1138_s25 }
  0x4c   : > { %p806_p8 = pnand %p805_p7, %p804_p0  ;;  %p811_p1 = por %p810_p13, %p809_p11 }
  0x4e   : > { %p807_p9 = pneg %p806_p8  ;;  %p813_p2 = por %p812_p4, %p811_p1 }
  0x50   : > { %p814_p12 = pnand %p813_p2, %p807_p9 }
  0x52   : > { %817 = shalt.err (!%p814_p12)
}
  0x53   : > { %s818_s28 = scalar_lea.vmem %s1131_s14, 1024  ;;  %s962_s26 = smov [#allocation6]  }
  0x54   : > { %p819_p3 = scmp.ne.s32.totalorder %s1131_s14, %s818_s28  ;;  %s823_s10 = sshll.u32 %s962_s26, 4  ;;  %s824_s10 = int_to_ptr.vmem [resolvable:$false] %s823_s10 }
  0x55   : > { %s825_s27 = scalar_lea.vmem %s824_s10, 2048  ;;  %p826_p0 = scmp.lt.s32.totalorder %s1131_s14, %s824_s10 }
  0x56   : > { %p821_p6 = pnand %p819_p3, %p805_p7  ;;  %p827_p8 = scmp.lt.s32.totalorder %s825_s27, %s818_s28 }
  0x58   : > { %p822_p10 = pneg %p821_p6  ;;  %p828_p11 = por %p827_p8, %p826_p0 }
  0x5a   : > { %p829_p13 = pnand %p828_p11, %p822_p10 }
  0x5c   : > { %832 = shalt.err (!%p829_p13)
}
  0x5d   : > { %s963_s30 = smov 128   ;;  %s964_s15 = smov 64  }
  0x5e   : > { %s965_s8 = smov 4   ;;  %p1334_p7 = scmp.ne.s32.totalorder %s1325_s9, 0 }
  0x5f   : > { %657 = dma.hbm_to_vmem [thread:$0]  (!%p1333_p5), %s1138_s25, 1024, %s1131_s14, %s1150_s23, %s963_s30, %s964_s15, %s965_s8  }
  0x60   : > { %226 = sbr.rel (%p1334_p7) target bundleno = 480 (0x1e0), region = 36  ;;  %p1335_p9 = scmp.ne.s32.totalorder (!%p1334_p7), %s1319_s29, 0 }
  0x67   : > { %906 = dma.done.wait (%p1335_p9), [#allocation4], 256  }
  0x68   : > { %908 = vsyncadd (%p1335_p9), [#allocation4], 4294967040  ;;  %s232_s0 = sand.u32 1, %s935_s19   ;;  %p1336_p1 = scmp.ne.s32.totalorder %s1321_s6, 0 }
  0x69   : > { %s590_s12 = sshll.u32 %s232_s0, 6  ;;  %s233_s18 = scalar_lea.sflag [#allocation7], %s232_s0 }
  0x6a   : > { %s1185_s28 = scalar_lea.vmem [#allocation6], %s590_s12 }
  0x6b   : > { %910 = dma.done.wait (%p1336_p1), %s233_s18, 1024  }
  0x6c   : > { %912 = vsyncadd (%p1336_p1), %s233_s18, 4294966272  ;;  %s264_s23 = sand.u32 1, %s923_s16   ;;  %p268_p5 = scmp.lt.s32.totalorder %s947_s22, 1 }
  0x6d   : > { %s1195_s25 = sshll.u32 %s264_s23, 3  ;;  %p592_p4 = scmp.ne.s32.totalorder %s943_s21, 0 }
  0x6e   : > { %s1198_s29 = scalar_select %p268_p5, %s947_s22, 1 }
  0x6f   : > { %s266_s27 = scalar_lea.vmem [#allocation8], %s1195_s25  ;;  %278 = sbr.rel (%p592_p4) target bundleno = 118 (0x76), region = 48  ;;  %v966_v0 = vmov (!%p592_p4), 0.0  }
  0x70   : > { %s270_s14 = scalar_lea.vmem %s1299_s2, %s1198_s29  ;;  %s273_s10 = scalar_lea.vmem %s1300_s3, %s1198_s29  ;;  %279 = vst [vmem:[#allocation2] sm:$0xff] (!%p592_p4), %v966_v0 }
  0x76 PF: > { %v761_v1 = vld [vmem:[%s1185_s28] sm:$0xff]   ;;  %v967_v2 = vmov 0.0   ;;  %v762_v3 = vld [vmem:[%s1185_s28 + $0x8] sm:$0xff]   ;;  %vm968_vm0 = vmmov 0   ;;  %v763_v4 = vld [vmem:[%s1185_s28 + $0x10] sm:$0xff]   ;;  %s593_s30 = sshll.u32 %s943_s21, 7 }
  0x77   : > { %622 = vmatprep.subr.bf16.mxu0 %v967_v2  ;;  %638 = vmatprep.mubr.msk.bf16.mxu0 %vm968_vm0, %v967_v2  ;;  %v764_v5 = vld [vmem:[%s1185_s28 + $0x18] sm:$0xff]   ;;  %v765_v6 = vld [vmem:[%s1185_s28 + $0x20] sm:$0xff]   ;;  %s281_s15 = sshra.s32 %s593_s30, 7  ;;  %v766_v7 = vld [vmem:[%s1185_s28 + $0x28] sm:$0xff]   ;;  %p603_p2 = scmp.ne.s32.totalorder %s943_s21, 1 }
  0x78   : > { %623 = vmatpush3.bf16.msra.mxu0 %v761_v1  ;;  %s594_s8 = sshll.u32 %s281_s15, 3  ;;  %v767_v8 = vld [vmem:[%s1185_s28 + $0x30] sm:$0xff]   ;;  %v768_v9 = vld [vmem:[%s1185_s28 + $0x38] sm:$0xff]   ;;  %v287_v12 = vld [vmem:[#allocation2] sm:$0xff]  ;;  %v420_v36 = vlaneseq (!%p603_p2)  ;;  %s606_s9 = sshll.u32 (!%p603_p2), %s947_s22, 7 }
  0x79   : > { %624 = vmatprep.subr.bf16.mxu0 %v967_v2  ;;  %s284_s0 = scalar_lea.vmem [#allocation3], %s594_s8  ;;  %v415_v38 = vld [vmem:[%s270_s14] sm:$0x1] (!%p603_p2)  ;;  %s441_s13 = sshra.s32 (!%p603_p2), %s606_s9, 7 }
  0x7a   : > { %v285_v10 = vld [vmem:[%s284_s0] sm:$0xff]  ;;  %v421_v37 = vshrl.u32 (!%p603_p2), %v420_v36, 7  ;;  %s607_s14 = sshll.u32 (!%p603_p2), %s441_s13, 3 }
  0x7b   : > { %v286_v11 = vpack.c.bf16 %v285_v10, %v285_v10  ;;  %v604_v43 = vld [vmem:[%s273_s10] ss:$0 sm:$0xff] (!%p603_p2)  ;;  %s444_s6 = scalar_lea.vmem (!%p603_p2), [#allocation3], %s607_s14 }
  0x7c   : > { %625 = vmatpush3.bf16.msra.mxu0 %v762_v3  ;;  %v422_v39 = vsub.s32 (!%p603_p2), 0, %v421_v37  ;;  %v445_v49 = vld [vmem:[%s444_s6] sm:$0xff] (!%p603_p2) }
  0x7d   : > { %626 = vmatprep.subr.bf16.mxu0 %v967_v2 }
  0x80   : > { %627 = vmatpush3.bf16.msra.mxu0 %v763_v4 }
  0x81   : > { %628 = vmatprep.subr.bf16.mxu0 %v967_v2 }
  0x84   : > { %629 = vmatpush3.bf16.msra.mxu0 %v764_v5 }
  0x85   : > { %630 = vmatprep.subr.bf16.mxu0 %v967_v2 }
  0x88   : > { %631 = vmatpush3.bf16.msra.mxu0 %v765_v6 }
  0x89   : > { %632 = vmatprep.subr.bf16.mxu0 %v967_v2 }
  0x8c   : > { %633 = vmatpush3.bf16.msra.mxu0 %v766_v7 }
  0x8d   : > { %634 = vmatprep.subr.bf16.mxu0 %v967_v2 }
  0x90   : > { %635 = vmatpush3.bf16.msra.mxu0 %v767_v8 }
  0x91   : > { %636 = vmatprep.subr.bf16.mxu0 %v967_v2 }
  0x94   : > { %637 = vmatpush3.bf16.msra.mxu0 %v768_v9 }
  0x97   : > { %639 = vmatmul.mubr.bf16.vlgmr.msra.gmra.mrb[0].mxu0 %v286_v11 }
 0x167   : > { %397 = sbr.rel (%p603_p2) target bundleno = 455 (0x1c7), region = 52 }
 0x16a   : > { %v386_v13 = vpop.f32.mrb[0].mxu0 }
 0x16b   : > { %v392_v14 = vadd.f32 %v386_v13, %v287_v12  ;;  %v640_v15 = vpop.f32.mrb[1].mxu0 }
 0x16c   : > { %v389_v16 = vpop.f32.mrb[2].mxu0 }
 0x16d   : > { %393 = vst [vmem:[#allocation2] sm:$0xff] %v392_v14  ;;  %v641_v17 = vpop.f32.mrb[3].mxu0 }
 0x174   : > { %v398_v18 = vld [vmem:[#allocation2] sm:$0xff] }
 0x175   : > { %v399_v19 = vrot.slane %v398_v18, 4 }
 0x177   : > { %v400_v20 = vadd.f32 %v399_v19, %v398_v18 }
 0x179   : > { %v401_v21 = vrot.slane %v400_v20, 2 }
 0x17b   : > { %v402_v22 = vadd.f32 %v401_v21, %v400_v20 }
 0x17d   : > { %v403_v23 = vrot.slane %v402_v22, 1 }
 0x17f   : > { %v404_v24 = vadd.f32 %v403_v23, %v402_v22 }
 0x181   : > { %v405_v25 = vmul.f32 0.125, %v404_v24 }
 0x183   : > { %v406_v26 = vsub.f32 %v398_v18, %v405_v25 }
 0x185   : > { %v407_v27 = vmul.f32 %v406_v26, %v406_v26 }
 0x187   : > { %v408_v28 = vrot.slane %v407_v27, 4 }
 0x189   : > { %v409_v29 = vadd.f32 %v408_v28, %v407_v27 }
 0x18b   : > { %v410_v30 = vrot.slane %v409_v29, 2 }
 0x18d   : > { %v411_v31 = vadd.f32 %v410_v30, %v409_v29 }
 0x18f   : > { %v412_v32 = vrot.slane %v411_v31, 1 }
 0x191   : > { %v413_v33 = vadd.f32 %v412_v32, %v411_v31 }
 0x193   : > { %v414_v34 = vmul.f32 0.125, %v413_v33 }
 0x195   : > { %v416_v35 = vadd.f32 1e-05, %v414_v34 }
 0x197   : > { %769 = vrsqrt.f32 %v416_v35 }
 0x1a1   : > { %v770_v40 = vpop.eup %769 }
 0x1a2   : > { %v418_v41 = vmul.f32 %v770_v40, %v415_v38 }
 0x1a4   : > { %v423_v42 = vrot.slane %v418_v41, %v422_v39 }
 0x1a6   : > { %v425_v44 = vmul.f32 %v423_v42, %v406_v26 }
 0x1a8   : > { %v433_v45 = vadd.f32 %v604_v43, %v425_v44 }
 0x1aa   : > { %v605_v46 = vmul.f32 -1.442695, %v433_v45 }
 0x1ac   : > { %771 = vpow2.f32 %v605_v46 }
 0x1b6   : > { %v772_v47 = vpop.eup %771 }
 0x1b7   : > { %v437_v48 = vadd.f32 1.0, %v772_v47 }
 0x1b9   : > { %773 = vrcp.f32 %v437_v48 }
 0x1c3   : > { %v774_v50 = vpop.eup %773 }
 0x1c4   : > { %v446_v51 = vmul.f32 %v774_v50, %v445_v49 }
 0x1c6   : > { %447 = vst [vmem:[%s266_s27] sm:$0xff] %v446_v51 }
 0x1c7 PF: > { %s609_s29 = sshll.u32 %s947_s22, 7  ;;  %s462_s15 = sshll.u32 %s266_s27, 4  ;;  %s463_s15 = int_to_ptr.vmem [resolvable:$true] %s462_s15 }
 0x1c8   : > { %s1237_s30 = scalar_lea.hbm %s1301_s4, %s609_s29  ;;  %s449_s8 = scalar_lea.sflag [#allocation5], %s264_s23 }
 0x1c9   : > { %s833_s0 = scalar_lea.vmem %s463_s15, 128  ;;  %p1337_p3 = scmp.ne.s32.totalorder %s1322_s7, 0 }
 0x1ca   : > { %p834_p12 = scmp.ne.s32.totalorder %s463_s15, %s833_s0  ;;  %s969_s21 = smov [#allocation8]  }
 0x1cb   : > { %s837_s12 = sshll.u32 %s969_s21, 4  ;;  %s838_s12 = int_to_ptr.vmem [resolvable:$false] %s837_s12 }
 0x1cc   : > { %p835_p6 = pnand %p834_p12, %p1337_p3  ;;  %s839_s18 = scalar_lea.vmem %s838_s12, 256 }
 0x1cd   : > { %p840_p0 = scmp.lt.s32.totalorder %s463_s15, %s838_s12  ;;  %p841_p8 = scmp.lt.s32.totalorder %s839_s18, %s833_s0 }
 0x1ce   : > { %p836_p10 = pneg %p835_p6 }
 0x1cf   : > { %p842_p11 = por %p841_p8, %p840_p0 }
 0x1d1   : > { %p843_p13 = pnand %p842_p11, %p836_p10 }
 0x1d3   : > { %846 = shalt.err (!%p843_p13)
}
 0x1d4   : > { %s847_s22 = scalar_lea.hbm %s1237_s30, 128  ;;  %s851_s27 = scalar_lea.hbm %s1301_s4, 256 }
 0x1d5   : > { %p848_p7 = scmp.ne.s32.totalorder %s1237_s30, %s847_s22  ;;  %p852_p5 = scmp.lt.u32.totalorder %s1237_s30, %s1301_s4 }
 0x1d6   : > { %p853_p4 = scmp.lt.u32.totalorder %s851_s27, %s847_s22  ;;  %p855_p12 = scmp.lt.u32.totalorder %s847_s22, %s1237_s30 }
 0x1d7   : > { %p849_p9 = pnand %p848_p7, %p1337_p3 }
 0x1d8   : > { %p854_p2 = por %p853_p4, %p852_p5 }
 0x1d9   : > { %p850_p1 = pneg %p849_p9 }
 0x1da   : > { %p856_p6 = por %p855_p12, %p854_p2 }
 0x1dc   : > { %p857_p10 = pnand %p856_p6, %p850_p1 }
 0x1de   : > { %860 = shalt.err (!%p857_p10)
}
 0x1df   : > { %648 = dma.vmem_to_hbm [thread:$0]  (%p1337_p3), %s463_s15, 128, %s1237_s30, %s449_s8  }
 0x1e0 PF: > { %s1338_s13 = sld [smem:[#allocation14_spill]]  ;;  %s1339_s14 = sld [smem:[#allocation12_spill]] }
 0x1e1   : > { %s1340_s6 = sld [smem:[#allocation15_spill]] }
 0x1e6   : > { %p665_p0 = scmp.ge.s32.totalorder %s1338_s13, 2  ;;  %s474_s29 = sand.u32 1, %s1339_s14  }
 0x1e7   : > { %p1341_p8 = scmp.ne.s32.totalorder %s1340_s6, 0  ;;  %s475_s26 = scalar_lea.sflag [#allocation5], %s474_s29 }
 0x1e9   : > { %p659_p11 = pnand %p665_p0, %p1341_p8 }
 0x1eb   : > { %914 = dma.done.wait (!%p659_p11), %s475_s26, 128  }
 0x1ec   : > { %916 = vsyncadd (!%p659_p11), %s475_s26, 4294967168  ;;  %s21_s25 = sadd.s32 1, %s1338_s13   ;;  %s1342_s21 = sld [smem:[#allocation13_spill]] }
 0x1ed   : > { %p18_p13 = scmp.ge.s32.totalorder %s21_s25, 6   ;;  %s1343_s23 = sld [smem:[#allocation16_spill]] }
 0x1ee   : > { %s1344_s7 = sld [smem:[#allocation17_spill]]  ;;  %s1345_s15 = smov %s923_s16 }
 0x1ef   : > { %s1346_s16 = smov %s927_s17  ;;  %s1347_s17 = smov %s1143_s11 }
 0x1f0   : > { %s1348_s18 = smov %s935_s19  ;;  %s1349_s19 = smov %s939_s20 }
 0x1f1   : > { %s1350_s20 = smov %s1148_s5  ;;  %s1351_s22 = smov %s955_s24 }
 0x1f2   :  { %20 = sbr.rel (!%p18_p13) target bundleno = 12 (0xc), region = 102 }
 0x1f4   : > { %s1352_s24 = smov %s1344_s7 }
 0x1f9   :  { %480 = vsyncpa [#allocation4], 1 }
 0x1fa   :  { %482 = vsyncpa [#allocation4 + $0x1], 1 }
 0x1fb   :  { %483 = vsyncpa [#allocation7], 1 }
 0x1fc   :  { %485 = vsyncpa [#allocation7 + $0x1], 1 }
 0x1fd   :  { %486 = vsyncpa [#allocation5], 1 }
 0x1fe   :  { %488 = vsyncpa [#allocation5 + $0x1], 1 }

</bundles_post_ra>
